<compile_context>
chip_gen: v6e
topology: v6e:2x2x1
jax: 0.10.0
libtpu: 0.0.40
codegen_flags: <defaults>
</compile_context>

<pallas_src>
import math

import jax
import jax.numpy as jnp
from jax.experimental import pallas as pl
from jax.experimental.pallas import tpu as pltpu


def audionet_kernel(x_ref, w1_ref, b1_ref, w2_ref, b2_ref, w3_ref, b3_ref, o_ref):
    """Fused 3-layer MLP forward: relu(x@W1+b1) -> relu(.@W2+b2) -> .@W3+b3.

    Matmul inputs are cast to bf16 (native MXU dtype on v5e/v6e/v7x) with f32
    accumulation; elementwise bias-add / ReLU run in f32 on the VPU.
    """
    x = x_ref[...].astype(jnp.bfloat16)

    h1 = jnp.dot(x, w1_ref[...].astype(jnp.bfloat16),
                 preferred_element_type=jnp.float32)
    h1 = jnp.maximum(h1 + b1_ref[...], 0.0)

    h2 = jnp.dot(h1.astype(jnp.bfloat16), w2_ref[...].astype(jnp.bfloat16),
                 preferred_element_type=jnp.float32)
    h2 = jnp.maximum(h2 + b2_ref[...], 0.0)

    out = jnp.dot(h2.astype(jnp.bfloat16), w3_ref[...].astype(jnp.bfloat16),
                  preferred_element_type=jnp.float32)
    o_ref[...] = (out + b3_ref[...]).astype(o_ref.dtype)


def audionet_forward(x, params, *, tb=2048):
    """x: (B, 13) float32. params: dict of (in,out) weights and (1,out) biases.

    Batch is tiled into TB-row blocks (default 2048; clamped for tiny batches).
    B is padded up to a multiple of TB and the result sliced back, so any B works.
    """
    w1, b1 = params["w1"], params["b1"]
    w2, b2 = params["w2"], params["b2"]
    w3, b3 = params["w3"], params["b3"]
    B, F_in = x.shape
    F_out = w3.shape[1]

    # Clamp tile to the (8-row aligned) batch so small batches stay a single tile.
    tb = max(8, min(tb, pl.cdiv(B, 8) * 8))
    b_pad = pl.cdiv(B, tb) * tb
    if b_pad != B:
        x = jnp.pad(x, ((0, b_pad - B), (0, 0)))
    grid = (b_pad // tb,)

    const = lambda shape: pl.BlockSpec(shape, lambda i: (0, 0))  # VMEM-resident

    out = pl.pallas_call(
        audionet_kernel,
        out_shape=jax.ShapeDtypeStruct((b_pad, F_out), jnp.float32),
        grid=grid,
        in_specs=[
            pl.BlockSpec((tb, F_in), lambda i: (i, 0)),   # x: batch-tiled
            const(w1.shape), const(b1.shape),
            const(w2.shape), const(b2.shape),
            const(w3.shape), const(b3.shape),
        ],
        out_specs=pl.BlockSpec((tb, F_out), lambda i: (i, 0)),
        compiler_params=pltpu.CompilerParams(
            dimension_semantics=("parallel",),            # megacore shard on v7x
            vmem_limit_bytes=32 * 1024 * 1024,            # safe on v5e/v6e/v7x
        ),
    )(x, w1, b1, w2, b2, w3, b3)

    return out[:B]


def init_params(key):
    """Deterministic init mimicking PyTorch nn.Linear defaults (U[-1/sqrt(fan_in), +])."""
    dims = [(13, 64), (64, 32), (32, 2)]
    params = {}
    for i, (fan_in, fan_out) in enumerate(dims, start=1):
        key, kw, kb = jax.random.split(key, 3)
        bound = 1.0 / math.sqrt(fan_in)
        # stored already transposed to (in, out) for x @ W
        params[f"w{i}"] = jax.random.uniform(
            kw, (fan_in, fan_out), jnp.float32, -bound, bound)
        params[f"b{i}"] = jax.random.uniform(
            kb, (1, fan_out), jnp.float32, -bound, bound)
    return params


def audionet_reference(x, params):
    """Pure-JAX f32 reference for correctness check."""
    h = jnp.maximum(x @ params["w1"] + params["b1"], 0.0)
    h = jnp.maximum(h @ params["w2"] + params["b2"], 0.0)
    return h @ params["w3"] + params["b3"]


if __name__ == "__main__":
    key = jax.random.PRNGKey(0)
    kp, kx1, kx2 = jax.random.split(key, 3)
    params = init_params(kp)

    # bf16 MXU inputs (f32 accumulation) -> compare against f32 reference with
    # a tolerance matching ~2^-8 input rounding over short (13/64/32) contractions.
    TOL = dict(atol=3e-2, rtol=3e-2)

    # Small deployment-style batch (single tile, single grid step).
    B_small = 8
    x_small = jax.random.normal(kx1, (B_small, 13), jnp.float32)
    out_small = jax.block_until_ready(audionet_forward(x_small, params))
    ref_small = audionet_reference(x_small, params)
    assert out_small.shape == (B_small, 2), out_small.shape
    assert jnp.allclose(out_small, ref_small, **TOL), "small-batch mismatch vs reference"

    # Larger ragged batch: exercises the batch grid, padding, and slicing
    # (B=2500 with TB=1024 -> pad to 3072, grid=(3,)).
    B_big = 2500
    x_big = jax.random.normal(kx2, (B_big, 13), jnp.float32)
    out_big = jax.block_until_ready(audionet_forward(x_big, params, tb=1024))
    ref_big = audionet_reference(x_big, params)
    assert out_big.shape == (B_big, 2), out_big.shape
    assert jnp.allclose(out_big, ref_big, **TOL), "batched mismatch vs reference"

    print("KERNEL_OK")
</pallas_src>

<mosaic_0001>
module attributes {stable_mosaic.version = 11 : i64} {
  func.func @audionet_kernel(%arg0: i32, %arg1: memref<8x13xf32, #tpu.memory_space<vmem>>, %arg2: memref<13x64xf32, #tpu.memory_space<vmem>>, %arg3: memref<1x64xf32, #tpu.memory_space<vmem>>, %arg4: memref<64x32xf32, #tpu.memory_space<vmem>>, %arg5: memref<1x32xf32, #tpu.memory_space<vmem>>, %arg6: memref<32x2xf32, #tpu.memory_space<vmem>>, %arg7: memref<1x2xf32, #tpu.memory_space<vmem>>, %arg8: memref<8x2xf32, #tpu.memory_space<vmem>>) attributes {dimension_semantics = [#tpu.dimension_semantics<parallel>], iteration_bounds = array<i64: 1>, scalar_prefetch = 0 : i64, scratch_operands = 0 : i64, tpu.core_type = #tpu.core_type<tc>, window_params = [{transform_indices = @transform_0, window_bounds = array<i64: 8, 13>}, {pipeline_mode = #tpu.pipeline_mode<synchronous>, transform_indices = @transform_1, window_bounds = array<i64: 13, 64>}, {pipeline_mode = #tpu.pipeline_mode<synchronous>, transform_indices = @transform_2, window_bounds = array<i64: 1, 64>}, {pipeline_mode = #tpu.pipeline_mode<synchronous>, transform_indices = @transform_3, window_bounds = array<i64: 64, 32>}, {pipeline_mode = #tpu.pipeline_mode<synchronous>, transform_indices = @transform_4, window_bounds = array<i64: 1, 32>}, {pipeline_mode = #tpu.pipeline_mode<synchronous>, transform_indices = @transform_5, window_bounds = array<i64: 32, 2>}, {pipeline_mode = #tpu.pipeline_mode<synchronous>, transform_indices = @transform_6, window_bounds = array<i64: 1, 2>}, {transform_indices = @transform_7, window_bounds = array<i64: 8, 2>}]} {
    %c0 = arith.constant 0 : index
    %c0_0 = arith.constant 0 : index
    %0 = vector.load %arg1[%c0, %c0_0] : memref<8x13xf32, #tpu.memory_space<vmem>>, vector<8x13xf32>
    %1 = arith.truncf %0 : vector<8x13xf32> to vector<8x13xbf16>
    %c0_1 = arith.constant 0 : index
    %c0_2 = arith.constant 0 : index
    %2 = vector.load %arg2[%c0_1, %c0_2] : memref<13x64xf32, #tpu.memory_space<vmem>>, vector<13x64xf32>
    %3 = arith.truncf %2 : vector<13x64xf32> to vector<13x64xbf16>
    %cst = arith.constant dense<0.000000e+00> : vector<8x64xf32>
    %4 = tpu.matmul %1, %3, %cst {dimension_numbers = #tpu.dot_dimension_numbers<[1], [0], [0], [1], [0, 0, 1, 1], [], []>} : vector<8x13xbf16>, vector<13x64xbf16>, vector<8x64xf32> -> vector<8x64xf32>
    %c0_3 = arith.constant 0 : index
    %c0_4 = arith.constant 0 : index
    %5 = vector.load %arg3[%c0_3, %c0_4] : memref<1x64xf32, #tpu.memory_space<vmem>>, vector<1x64xf32>
    %6 = vector.broadcast %5 : vector<1x64xf32> to vector<8x64xf32>
    %7 = arith.addf %4, %6 : vector<8x64xf32>
    %cst_5 = arith.constant 0.000000e+00 : f32
    %8 = vector.broadcast %cst_5 : f32 to vector<8x64xf32>
    %9 = arith.maximumf %7, %8 : vector<8x64xf32>
    %10 = arith.truncf %9 : vector<8x64xf32> to vector<8x64xbf16>
    %c0_6 = arith.constant 0 : index
    %c0_7 = arith.constant 0 : index
    %11 = vector.load %arg4[%c0_6, %c0_7] : memref<64x32xf32, #tpu.memory_space<vmem>>, vector<64x32xf32>
    %12 = arith.truncf %11 : vector<64x32xf32> to vector<64x32xbf16>
    %cst_8 = arith.constant dense<0.000000e+00> : vector<8x32xf32>
    %13 = tpu.matmul %10, %12, %cst_8 {dimension_numbers = #tpu.dot_dimension_numbers<[1], [0], [0], [1], [0, 0, 1, 1], [], []>} : vector<8x64xbf16>, vector<64x32xbf16>, vector<8x32xf32> -> vector<8x32xf32>
    %c0_9 = arith.constant 0 : index
    %c0_10 = arith.constant 0 : index
    %14 = vector.load %arg5[%c0_9, %c0_10] : memref<1x32xf32, #tpu.memory_space<vmem>>, vector<1x32xf32>
    %15 = vector.broadcast %14 : vector<1x32xf32> to vector<8x32xf32>
    %16 = arith.addf %13, %15 : vector<8x32xf32>
    %cst_11 = arith.constant 0.000000e+00 : f32
    %17 = vector.broadcast %cst_11 : f32 to vector<8x32xf32>
    %18 = arith.maximumf %16, %17 : vector<8x32xf32>
    %19 = arith.truncf %18 : vector<8x32xf32> to vector<8x32xbf16>
    %c0_12 = arith.constant 0 : index
    %c0_13 = arith.constant 0 : index
    %20 = vector.load %arg6[%c0_12, %c0_13] : memref<32x2xf32, #tpu.memory_space<vmem>>, vector<32x2xf32>
    %21 = arith.truncf %20 : vector<32x2xf32> to vector<32x2xbf16>
    %cst_14 = arith.constant dense<0.000000e+00> : vector<8x2xf32>
    %22 = tpu.matmul %19, %21, %cst_14 {dimension_numbers = #tpu.dot_dimension_numbers<[1], [0], [0], [1], [0, 0, 1, 1], [], []>} : vector<8x32xbf16>, vector<32x2xbf16>, vector<8x2xf32> -> vector<8x2xf32>
    %c0_15 = arith.constant 0 : index
    %c0_16 = arith.constant 0 : index
    %23 = vector.load %arg7[%c0_15, %c0_16] : memref<1x2xf32, #tpu.memory_space<vmem>>, vector<1x2xf32>
    %24 = vector.broadcast %23 : vector<1x2xf32> to vector<8x2xf32>
    %25 = arith.addf %22, %24 : vector<8x2xf32>
    %c0_17 = arith.constant 0 : index
    %c0_18 = arith.constant 0 : index
    %26 = vector.load %arg8[%c0_17, %c0_18] : memref<8x2xf32, #tpu.memory_space<vmem>>, vector<8x2xf32>
    tpu.vector_store %arg8[%c0_17, %c0_18], %25 {strides = array<i32>} : memref<8x2xf32, #tpu.memory_space<vmem>>, vector<8x2xf32>,
    return
  }
  func.func @transform_0(%arg0: i32) -> (i32, i32) {
    %c0_i32 = arith.constant 0 : i32
    %c0_i32_0 = arith.constant 0 : i32
    return %arg0, %c0_i32 : i32, i32
  }
  func.func @transform_1(%arg0: i32) -> (i32, i32) {
    %c0_i32 = arith.constant 0 : i32
    %c0_i32_0 = arith.constant 0 : i32
    %c0_i32_1 = arith.constant 0 : i32
    return %c0_i32, %c0_i32_0 : i32, i32
  }
  func.func @transform_2(%arg0: i32) -> (i32, i32) {
    %c0_i32 = arith.constant 0 : i32
    %c0_i32_0 = arith.constant 0 : i32
    %c0_i32_1 = arith.constant 0 : i32
    return %c0_i32, %c0_i32_0 : i32, i32
  }
  func.func @transform_3(%arg0: i32) -> (i32, i32) {
    %c0_i32 = arith.constant 0 : i32
    %c0_i32_0 = arith.constant 0 : i32
    %c0_i32_1 = arith.constant 0 : i32
    return %c0_i32, %c0_i32_0 : i32, i32
  }
  func.func @transform_4(%arg0: i32) -> (i32, i32) {
    %c0_i32 = arith.constant 0 : i32
    %c0_i32_0 = arith.constant 0 : i32
    %c0_i32_1 = arith.constant 0 : i32
    return %c0_i32, %c0_i32_0 : i32, i32
  }
  func.func @transform_5(%arg0: i32) -> (i32, i32) {
    %c0_i32 = arith.constant 0 : i32
    %c0_i32_0 = arith.constant 0 : i32
    %c0_i32_1 = arith.constant 0 : i32
    return %c0_i32, %c0_i32_0 : i32, i32
  }
  func.func @transform_6(%arg0: i32) -> (i32, i32) {
    %c0_i32 = arith.constant 0 : i32
    %c0_i32_0 = arith.constant 0 : i32
    %c0_i32_1 = arith.constant 0 : i32
    return %c0_i32, %c0_i32_0 : i32, i32
  }
  func.func @transform_7(%arg0: i32) -> (i32, i32) {
    %c0_i32 = arith.constant 0 : i32
    %c0_i32_0 = arith.constant 0 : i32
    return %arg0, %c0_i32 : i32, i32
  }
}

</mosaic_0001>

<bundles_post_ra>
// kernel: tpu_custom_call.1
= control target key start
LH: loop header
LB: loop body
LE: loop exit
PB: predicated region body
PF: predicated region fallthrough
CT: control target
= control target key end

     0   :  { %vm43_vm0 = vcmask 1045504   ;;  %vm44_vm1 = vcmask 1046528   ;;  %v265_v0 = vmov 0.0   ;;  %v266_v3 = vmov 65535   ;;  %s368_s1 = inlined_call_operand.vmem [shape: f32[13,64], index: 1, kind: input, shape index: {}]   ;;  %s369_s0 = inlined_call_operand.vmem [shape: f32[8,13], index: 0, kind: input, shape index: {}]   ;;  %s370_s3 = inlined_call_operand.vmem [shape: f32[64,32], index: 3, kind: input, shape index: {}]   ;;  %s371_s5 = inlined_call_operand.vmem [shape: f32[32,2], index: 5, kind: input, shape index: {}]   ;;  %s372_s2 = inlined_call_operand.vmem [shape: f32[1,64], index: 2, kind: input, shape index: {}]   ;;  %s373_s4 = inlined_call_operand.vmem [shape: f32[1,32], index: 4, kind: input, shape index: {}]   ;;  %s374_s6 = inlined_call_operand.vmem [shape: f32[1,2], index: 6, kind: input, shape index: {}]   ;;  %s375_s7 = inlined_call_operand.vmem [shape: f32[8,2], index: 7, kind: output, shape index: {}]  }
   0x1   :  { %236 = vmatprep.subr.bf16.mxu0 %v265_v0  ;;  %v29_v1 = vld [vmem:[%s368_s1] sm:$0xff]  ;;  %v30_v2 = vld [vmem:[%s368_s1 + $0x8] sm:$0x1f]  ;;  %v45_v4 = vsel %vm43_vm0, 4294967295, %v266_v3  ;;  %242 = vmatprep.subr.bf16.mxu1 %v265_v0  ;;  %vm267_vm2 = vmmov 0   ;;  %v98_v8 = vld [vmem:[%s370_s3 + $0x30] sm:$0xff] }
   0x2   :  { %v27_v5 = vld [vmem:[%s369_s0] sm:$0xff]  ;;  %v31_v6 = vpack.c.bf16 %v30_v2, %v29_v1  ;;  %v46_v7 = vsel %vm44_vm1, %v45_v4, 0  ;;  %238 = vmatprep.mubr.msk.bf16.mxu0 %vm267_vm2, %v265_v0  ;;  %v99_v9 = vld [vmem:[%s370_s3 + $0x38] sm:$0xff]  ;;  %250 = vmatprep.mubr.msk.bf16.mxu1 %vm267_vm2, %v265_v0  ;;  %v97_v12 = vld [vmem:[%s370_s3 + $0x28] sm:$0xff]  ;;  %vm39_vm3 = vcmask 105472   ;;  %vm111_vm4 = vcmask 523264  }
   0x3   :  { %v96_v10 = vld [vmem:[%s370_s3 + $0x20] sm:$0xff]  ;;  %v103_v11 = vpack.c.bf16 %v99_v9, %v98_v8  ;;  %v28_v14 = vpack.c.bf16 %v27_v5, %v27_v5  ;;  %v94_v16 = vld [vmem:[%s370_s3 + $0x10] sm:$0xff]  ;;  %v95_v17 = vld [vmem:[%s370_s3 + $0x18] sm:$0xff]  ;;  %vm170_vm5 = vcmask 261120   ;;  %vm214_vm6 = vcmask 15360  }
   0x4   :  { %v48_v13 = vand.u32 %v46_v7, %v31_v6  ;;  %v102_v15 = vpack.c.bf16 %v97_v12, %v96_v10  ;;  %v101_v18 = vpack.c.bf16 %v95_v17, %v94_v16  ;;  %v92_v19 = vld [vmem:[%s370_s3] sm:$0xff]  ;;  %v93_v20 = vld [vmem:[%s370_s3 + $0x8] sm:$0xff]  ;;  %v159_v22 = vld [vmem:[%s371_s5 + $0x10] sm:$0xff] }
   0x5   :  { %243 = vmatpush3.bf16.msra.mxu1 %v103_v11  ;;  %v100_v21 = vpack.c.bf16 %v93_v20, %v92_v19  ;;  %v160_v23 = vld [vmem:[%s371_s5 + $0x18] sm:$0xff]  ;;  %v220_v25 = vld [vmem:[%s372_s2] ss:$0 sm:$0xff]  ;;  %v158_v34 = vld [vmem:[%s371_s5 + $0x8] sm:$0xff] }
   0x6   :  { %237 = vmatpush3.bf16.msra.mxu0 %v48_v13  ;;  %244 = vmatprep.subr.bf16.mxu1 %v265_v0  ;;  %v162_v24 = vpack.c.bf16 %v160_v23, %v159_v22  ;;  %v157_v33 = vld [vmem:[%s371_s5] sm:$0xff] }
   0x7   :  { %254 = vmatprep.subr.bf16.mxu0 %v265_v0  ;;  %v161_v35 = vpack.c.bf16 %v158_v34, %v157_v33  ;;  %v222_v36 = vld [vmem:[%s373_s4] ss:$0 sm:$0xff] }
   0x8   :  { %v224_v44 = vld [vmem:[%s374_s6] ss:$0 sm:$0xff] }
   0x9   :  { %239 = vmatmul.mubr.msk.bf16.vlgmr.msra.gmra.mxu0 %vm39_vm3, %v28_v14  ;;  %245 = vmatpush3.bf16.msra.mxu1 %v102_v15 }
   0xa   :  { %246 = vmatprep.subr.bf16.mxu1 %v265_v0  ;;  %258 = vmatprep.mubr.msk.bf16.mxu0 %vm267_vm2, %v265_v0 }
   0xb   :  { %255 = vmatpush3.bf16.msra.mxu0 %v162_v24 }
   0xc   :  { %256 = vmatprep.subr.bf16.mxu0 %v265_v0 }
   0xd   :  { %247 = vmatpush3.bf16.msra.mxu1 %v101_v18 }
   0xe   :  { %248 = vmatprep.subr.bf16.mxu1 %v265_v0 }
   0xf   :  { %257 = vmatpush3.bf16.msra.mxu0 %v161_v35 }
  0x11   :  { %249 = vmatpush3.bf16.msra.mxu1 %v100_v21 }
  0xc9   :  { %v84_v26 = vpop.f32.mrf.mxu0 }
  0xca   :  { %v85_v27 = vadd.f32 %v220_v25, %v84_v26 }
  0xcb   :  { %v240_v28 = vpop.f32.mrf.mxu0 }
  0xcc   :  { %v90_v29 = vmax.f32 %v85_v27, 0.0 }
  0xcd   :  { %v87_v30 = vpop.f32.mrf.mxu0 }
  0xce   :  { %v91_v31 = vpack.c.bf16 %v90_v29, %v90_v29 }
  0xcf   :  { %v241_v32 = vpop.f32.mrf.mxu0 }
  0xd0   :  { %251 = vmatmul.mubr.msk.bf16.vlgmr.msra.gmra.mxu1 %vm111_vm4, %v91_v31 }
 0x190   :  { %v149_v37 = vpop.f32.mrf.mxu1 }
 0x191   :  { %v150_v38 = vadd.f32 %v222_v36, %v149_v37 }
 0x192   :  { %v252_v39 = vpop.f32.mrf.mxu1 }
 0x193   :  { %v155_v40 = vmax.f32 %v150_v38, 0.0 }
 0x194   :  { %v152_v41 = vpop.f32.mrf.mxu1 }
 0x195   :  { %v156_v42 = vpack.c.bf16 %v155_v40, %v155_v40 }
 0x196   :  { %v253_v43 = vpop.f32.mrf.mxu1 }
 0x197   :  { %259 = vmatmul.mubr.msk.bf16.vlgmr.msra.gmra.mxu0 %vm170_vm5, %v156_v42 }
 0x257   :  { %v208_v45 = vpop.f32.mrf.mxu0 }
 0x258   :  { %v209_v46 = vadd.f32 %v224_v44, %v208_v45 }
 0x259   :  { %v260_v47 = vpop.f32.mrf.mxu0 }
 0x25a   :  { %215 = vst.msk [vmem:[%s375_s7] sm:$0xff] %vm214_vm6, %v209_v46 }
 0x25b   :  { %v211_v48 = vpop.f32.mrf.mxu0 }
 0x25d   :  { %v261_v49 = vpop.f32.mrf.mxu0 }

</bundles_post_ra>
